<compile_context>
chip_gen: v5e
topology: v5e:2x2
jax: 0.10.0
libtpu: 0.0.40
codegen_flags: <defaults>
</compile_context>

<pallas_src>
import functools

import jax
import jax.numpy as jnp
import numpy as np
from jax.experimental import pallas as pl
from jax.experimental.pallas import tpu as pltpu


# ----------------------------------------------------------------------------
# VMEM budget / K-tile selection (NC-aware, per-generation)
# ----------------------------------------------------------------------------
_SMALL_WEIGHT_BYTES = 8 * 1024 * 1024      # single-shot (no K grid) below this


def _vmem_budget_bytes():
    """Per-generation VMEM budget for the double-buffered working set.
    ~72% of physical VMEM, capped at 96 MiB (v5e/v6e ~92 MiB, v7x ~46 MiB).
    Falls back to a 64-MiB physical assumption (v7x-safe) if the query fails."""
    phys = 64 * 1024 * 1024
    try:
        info = pltpu.get_tpu_info()
        phys = int(getattr(info, "vmem_capacity_bytes", phys))
    except Exception:
        pass
    return min(int(phys * 0.72), 96 * 1024 * 1024)


def _choose_k_tile(d_padded, nc, b, budget_bytes):
    """Largest multiple-of-128 divisor of d_padded whose double-buffered
    bf16 (w, x) tiles plus the f32 residents fit inside budget_bytes."""
    resident = b * nc * 4                 # f32 teacher-logit accumulator scratch
    resident += 2 * (2 * b * nc * 4)      # outputs / outputs_kd f32 blocks (x2 buf)
    resident += 2 * nc * 4                # bias
    avail = budget_bytes - resident
    best = 128
    for kt in range(128, d_padded + 1, 128):
        if d_padded % kt != 0:
            continue
        per_step = 2 * kt * nc * 2 + 2 * b * kt * 2   # dbl-buffered bf16 w + x
        if per_step <= avail:
            best = kt
    return best


def _pad_axis_to_multiple(x, multiple, axis):
    size = x.shape[axis]
    pad = (-size) % multiple
    if pad == 0:
        return x
    widths = [(0, 0)] * x.ndim
    widths[axis] = (0, pad)
    return jnp.pad(x, widths)


# ----------------------------------------------------------------------------
# Shared in-kernel math
# ----------------------------------------------------------------------------
def _log_softmax_rows(z):
    m = jnp.max(z, axis=-1, keepdims=True)
    zc = z - m
    return zc - jnp.log(jnp.sum(jnp.exp(zc), axis=-1, keepdims=True))


def _ce_with_smem_labels(log_probs, labels_ref, batch, num_classes):
    """Mean CE over integer labels held in SMEM: per-row scalar compare,
    vectorised along the class (lane) axis.  batch is small and static."""
    iota = jax.lax.broadcasted_iota(jnp.int32, (1, num_classes), 1)
    total = jnp.float32(0.0)
    for i in range(batch):                            # static, fully unrolled
        row = log_probs[i:i + 1, :]                   # (1, NC) static slice
        total = total - jnp.sum(jnp.where(iota == labels_ref[i], row, 0.0))
    return total * (1.0 / batch)


def _loss_epilogue(labels_ref, out_ref, kd_ref, teacher, loss_ref, *,
                   alpha, tau, batch, num_classes, mode):
    B, NC = batch, num_classes

    # ---- base criterion: CE with integer labels, mean reduction ----
    log_probs = _log_softmax_rows(out_ref[...].astype(jnp.float32))
    base_loss = _ce_with_smem_labels(log_probs, labels_ref, B, NC)

    if mode == "soft":
        inv_tau = 1.0 / tau
        s = kd_ref[...].astype(jnp.float32) * inv_tau
        t = teacher * inv_tau

        log_p = _log_softmax_rows(s)                  # student log-probs

        # teacher: single exp pass, reused for probs and log-probs
        m_t = jnp.max(t, axis=-1, keepdims=True)
        zt = t - m_t
        e_t = jnp.exp(zt)
        sum_t = jnp.sum(e_t, axis=-1, keepdims=True)
        log_q = zt - jnp.log(sum_t)

        inner = jnp.sum(e_t * (log_q - log_p), axis=-1, keepdims=True)
        # exact division: the epilogue runs once per kernel, approx reciprocal
        # would only add error.
        kl = jnp.sum(inner / sum_t)
        distill = kl * (tau * tau) * (1.0 / (B * NC))
    else:  # "hard": CE(outputs_kd, argmax(teacher)), mean reduction
        class_ids = jax.lax.broadcasted_iota(jnp.int32, (B, NC), 1)
        idx_f = class_ids.astype(jnp.float32)
        t_max = jnp.max(teacher, axis=-1, keepdims=True)
        # first (lowest-index) max, matching torch/jnp argmax tie-break
        t_arg = -jnp.max(jnp.where(teacher == t_max, -idx_f, -jnp.inf),
                         axis=-1, keepdims=True)
        t_onehot = (idx_f == t_arg).astype(jnp.float32)
        log_pk = _log_softmax_rows(kd_ref[...].astype(jnp.float32))
        distill = -jnp.sum(log_pk * t_onehot) * (1.0 / B)

    loss_ref[0, 0] = base_loss * (1.0 - alpha) + distill * alpha


# ----------------------------------------------------------------------------
# Kernels
# ----------------------------------------------------------------------------
def _fused_single_kernel(labels_ref, x_ref, w_ref, b_ref, out_ref, kd_ref,
                         loss_ref, *, alpha, tau, batch, num_classes, mode):
    # Whole teacher matmul in one MXU call (bf16 x bf16 -> f32), then epilogue.
    teacher = jnp.dot(x_ref[...], w_ref[...],
                      preferred_element_type=jnp.float32)
    teacher = teacher + b_ref[...].astype(jnp.float32)
    _loss_epilogue(labels_ref, out_ref, kd_ref, teacher, loss_ref,
                   alpha=alpha, tau=tau, batch=batch,
                   num_classes=num_classes, mode=mode)


def _fused_tiled_kernel(labels_ref, x_ref, w_ref, b_ref, out_ref, kd_ref,
                        loss_ref, acc_ref, *, alpha, tau, batch,
                        num_classes, mode):
    k = pl.program_id(0)
    nk = pl.num_programs(0)

    @pl.when(k == 0)
    def _init():
        acc_ref[...] = jnp.zeros_like(acc_ref)

    # bf16 x bf16 -> f32 accumulation on the MXU
    acc_ref[...] += jnp.dot(x_ref[...], w_ref[...],
                            preferred_element_type=jnp.float32)

    @pl.when(k == nk - 1)
    def _epilogue():
        teacher = acc_ref[...] + b_ref[...].astype(jnp.float32)
        _loss_epilogue(labels_ref, out_ref, kd_ref, teacher, loss_ref,
                       alpha=alpha, tau=tau, batch=batch,
                       num_classes=num_classes, mode=mode)


def _ce_kernel(labels_ref, out_ref, loss_ref, *, batch, num_classes):
    log_probs = _log_softmax_rows(out_ref[...].astype(jnp.float32))
    loss_ref[0, 0] = _ce_with_smem_labels(log_probs, labels_ref,
                                          batch, num_classes)


# ----------------------------------------------------------------------------
# pallas_call wrappers
# ----------------------------------------------------------------------------
def fused_distillation_loss(x_flat, w, b, outputs, outputs_kd, labels, *,
                            mode, alpha, tau, force_tiled=False, k_tile=None):
    B, Dp = x_flat.shape
    NC = w.shape[1]
    labels1d = labels.reshape(B).astype(jnp.int32)
    budget = _vmem_budget_bytes()

    w_bytes = Dp * NC * 2
    working_set = w_bytes + B * Dp * 2 + 3 * B * NC * 4 + NC * 4
    use_single = ((not force_tiled)
                  and w_bytes <= _SMALL_WEIGHT_BYTES
                  and working_set <= budget)

    kernel_kwargs = dict(alpha=float(alpha), tau=float(tau),
                         batch=B, num_classes=NC, mode=mode)

    if use_single:
        # Single-shot fused kernel: no grid, no accumulator, no step overhead.
        kernel = functools.partial(_fused_single_kernel, **kernel_kwargs)
        out = pl.pallas_call(
            kernel,
            out_shape=jax.ShapeDtypeStruct((1, 1), jnp.float32),
            in_specs=[
                pl.BlockSpec(memory_space=pltpu.MemorySpace.SMEM),  # labels
                pl.BlockSpec((B, Dp), lambda: (0, 0)),              # x_flat (bf16)
                pl.BlockSpec((Dp, NC), lambda: (0, 0)),             # teacher w (bf16)
                pl.BlockSpec((1, NC), lambda: (0, 0)),              # teacher bias
                pl.BlockSpec((B, NC), lambda: (0, 0)),              # outputs
                pl.BlockSpec((B, NC), lambda: (0, 0)),              # outputs_kd
            ],
            out_specs=pl.BlockSpec(memory_space=pltpu.MemorySpace.SMEM),
            compiler_params=pltpu.CompilerParams(vmem_limit_bytes=budget),
        )(labels1d, x_flat, w, b, outputs, outputs_kd)
        return out[0, 0]

    # K-tiled fused kernel for large teacher weights.
    kt = int(k_tile) if k_tile is not None else _choose_k_tile(Dp, NC, B, budget)
    assert Dp % kt == 0, (Dp, kt)
    nk = Dp // kt

    kernel = functools.partial(_fused_tiled_kernel, **kernel_kwargs)
    grid_spec = pltpu.PrefetchScalarGridSpec(
        num_scalar_prefetch=1,                              # labels -> SMEM
        grid=(nk,),
        in_specs=[
            pl.BlockSpec((B, kt), lambda k, lbl: (0, k)),   # x_flat  (bf16, K-tiled)
            pl.BlockSpec((kt, NC), lambda k, lbl: (k, 0)),  # teacher w (bf16, K-tiled)
            pl.BlockSpec((1, NC), lambda k, lbl: (0, 0)),   # teacher bias
            pl.BlockSpec((B, NC), lambda k, lbl: (0, 0)),   # outputs (class token)
            pl.BlockSpec((B, NC), lambda k, lbl: (0, 0)),   # outputs_kd (dist token)
        ],
        out_specs=pl.BlockSpec(memory_space=pltpu.MemorySpace.SMEM),
        scratch_shapes=[pltpu.VMEM((B, NC), jnp.float32)],  # teacher-logit acc
    )
    out = pl.pallas_call(
        kernel,
        out_shape=jax.ShapeDtypeStruct((1, 1), jnp.float32),
        grid_spec=grid_spec,
        compiler_params=pltpu.CompilerParams(
            dimension_semantics=("arbitrary",),             # K axis carries the acc
            vmem_limit_bytes=budget,
        ),
    )(labels1d, x_flat, w, b, outputs, outputs_kd)
    return out[0, 0]


def cross_entropy_loss(outputs, labels):
    B, NC = outputs.shape
    labels1d = labels.reshape(B).astype(jnp.int32)
    out = pl.pallas_call(
        functools.partial(_ce_kernel, batch=B, num_classes=NC),
        out_shape=jax.ShapeDtypeStruct((1, 1), jnp.float32),
        in_specs=[pl.BlockSpec(memory_space=pltpu.MemorySpace.SMEM),
                  pl.BlockSpec((B, NC), lambda: (0, 0))],
        out_specs=pl.BlockSpec(memory_space=pltpu.MemorySpace.SMEM),
    )(labels1d, outputs)
    return out[0, 0]


# ----------------------------------------------------------------------------
# Module-level wrapper mirroring DistillationLoss.forward
# ----------------------------------------------------------------------------
class DistillationLossPallas:
    def __init__(self, teacher_w, teacher_b, distillation_type="soft",
                 alpha=0.5, tau=3.0):
        assert distillation_type in ("none", "soft", "hard")
        # teacher weight stored in bf16: the matmul is HBM-bound on reading w.
        # (documented deviation from an fp32 PyTorch teacher; in 'hard' mode a
        #  quantised teacher can flip argmax ties vs fp32.)
        w = jnp.asarray(teacher_w, dtype=jnp.bfloat16)
        self.d_in = w.shape[0]
        # zero-pad D to a multiple of 128: keeps (8,128) tiling, zero rows are
        # exact no-ops in the dot.
        self.teacher_w = _pad_axis_to_multiple(w, 128, axis=0)
        self.teacher_b = jnp.asarray(teacher_b, dtype=jnp.float32).reshape(1, -1)
        self.distillation_type = distillation_type
        self.alpha = alpha
        self.tau = tau

    def __call__(self, inputs, outputs, labels, *, force_tiled=False, k_tile=None):
        outputs_kd = None
        if isinstance(outputs, (tuple, list)):
            outputs, outputs_kd = outputs
        if self.distillation_type == "none":
            return cross_entropy_loss(outputs.astype(jnp.float32), labels)
        if outputs_kd is None:
            raise ValueError("expected Tuple[Tensor, Tensor] when distillation is on")

        B = inputs.shape[0]
        x_flat = inputs.reshape(B, -1).astype(jnp.bfloat16)
        assert x_flat.shape[1] == self.d_in
        x_flat = _pad_axis_to_multiple(x_flat, 128, axis=1)
        return fused_distillation_loss(
            x_flat, self.teacher_w, self.teacher_b,
            outputs.astype(jnp.float32), outputs_kd.astype(jnp.float32), labels,
            mode=self.distillation_type, alpha=self.alpha, tau=self.tau,
            force_tiled=force_tiled, k_tile=k_tile)


# ----------------------------------------------------------------------------
# Pure-JAX reference (PyTorch semantics) for correctness checks
# ----------------------------------------------------------------------------
def _reference(x_flat, outputs, outputs_kd, labels, w, b, alpha, tau, mode):
    teacher = x_flat @ w + b[0]
    log_probs = jax.nn.log_softmax(outputs, axis=1)
    base = -jnp.mean(jnp.take_along_axis(log_probs, labels[:, None], axis=1))
    if mode == "none":
        return base
    if mode == "soft":
        log_p = jax.nn.log_softmax(outputs_kd / tau, axis=1)
        log_q = jax.nn.log_softmax(teacher / tau, axis=1)
        kl = jnp.sum(jnp.exp(log_q) * (log_q - log_p))
        distill = kl * (tau * tau) / outputs_kd.size
    else:  # hard
        targets = jnp.argmax(teacher, axis=1)
        lp_kd = jax.nn.log_softmax(outputs_kd, axis=1)
        distill = -jnp.mean(jnp.take_along_axis(lp_kd, targets[:, None], axis=1))
    return base * (1.0 - alpha) + distill * alpha


if __name__ == "__main__":
    B, C, H, W = 8, 4, 16, 16          # inputs to the teacher model (NCHW)
    NUM_CLASSES = 128
    D = C * H * W                      # 1024 (128-aligned)
    ALPHA, TAU = 0.5, 3.0

    key = jax.random.PRNGKey(0)
    k_x, k_out, k_kd, k_lab, k_w, k_b, k_x2, k_w2, k_b2, k_lab2 = \
        jax.random.split(key, 10)

    inputs = jax.random.normal(k_x, (B, C, H, W), dtype=jnp.float32)
    outputs = jax.random.normal(k_out, (B, NUM_CLASSES), dtype=jnp.float32)
    outputs_kd = jax.random.normal(k_kd, (B, NUM_CLASSES), dtype=jnp.float32)
    labels = jax.random.randint(k_lab, (B,), 0, NUM_CLASSES, dtype=jnp.int32)

    teacher_w = jax.random.normal(k_w, (D, NUM_CLASSES), dtype=jnp.float32) * 0.02
    teacher_b = jax.random.normal(k_b, (1, NUM_CLASSES), dtype=jnp.float32) * 0.02

    # References use the same bf16-quantised teacher weight / input the module
    # stores (upcast to f32), so checks isolate kernel correctness from the
    # documented bf16 storage choice.
    w_q = teacher_w.astype(jnp.bfloat16).astype(jnp.float32)
    x_q = inputs.reshape(B, -1).astype(jnp.bfloat16).astype(jnp.float32)

    # ---- soft distillation (single-shot fused kernel) ----
    crit_soft = DistillationLossPallas(teacher_w, teacher_b, "soft", ALPHA, TAU)
    loss_soft = jax.block_until_ready(crit_soft(inputs, (outputs, outputs_kd), labels))
    ref_soft = _reference(x_q, outputs, outputs_kd, labels, w_q, teacher_b,
                          ALPHA, TAU, mode="soft")
    np.testing.assert_allclose(np.asarray(loss_soft), np.asarray(ref_soft),
                               rtol=1e-4, atol=1e-4)

    # ---- hard distillation (single-shot fused kernel) ----
    crit_hard = DistillationLossPallas(teacher_w, teacher_b, "hard", ALPHA, TAU)
    loss_hard = jax.block_until_ready(crit_hard(inputs, (outputs, outputs_kd), labels))
    ref_hard = _reference(x_q, outputs, outputs_kd, labels, w_q, teacher_b,
                          ALPHA, TAU, mode="hard")
    np.testing.assert_allclose(np.asarray(loss_hard), np.asarray(ref_hard),
                               rtol=1e-4, atol=1e-4)

    # ---- hard distillation, forced K-tiled path (exercises the grid kernel) ----
    loss_hard_t = jax.block_until_ready(
        crit_hard(inputs, (outputs, outputs_kd), labels,
                  force_tiled=True, k_tile=512))
    np.testing.assert_allclose(np.asarray(loss_hard_t), np.asarray(ref_hard),
                               rtol=1e-4, atol=1e-4)

    # ---- 'none' path (CE-only specialised kernel) ----
    crit_none = DistillationLossPallas(teacher_w, teacher_b, "none", ALPHA, TAU)
    loss_none = jax.block_until_ready(crit_none(inputs, (outputs, outputs_kd), labels))
    ref_none = _reference(x_q, outputs, outputs_kd, labels, w_q, teacher_b,
                          ALPHA, TAU, mode="none")
    np.testing.assert_allclose(np.asarray(loss_none), np.asarray(ref_none),
                               rtol=1e-4, atol=1e-4)

    # ---- soft distillation with a non-128-aligned D (zero-pad path) ----
    C2, H2, W2 = 3, 10, 10
    D2 = C2 * H2 * W2                  # 300 -> padded to 384 inside the module
    inputs2 = jax.random.normal(k_x2, (B, C2, H2, W2), dtype=jnp.float32)
    labels2 = jax.random.randint(k_lab2, (B,), 0, NUM_CLASSES, dtype=jnp.int32)
    teacher_w2 = jax.random.normal(k_w2, (D2, NUM_CLASSES), dtype=jnp.float32) * 0.02
    teacher_b2 = jax.random.normal(k_b2, (1, NUM_CLASSES), dtype=jnp.float32) * 0.02
    w_q2 = teacher_w2.astype(jnp.bfloat16).astype(jnp.float32)
    x_q2 = inputs2.reshape(B, -1).astype(jnp.bfloat16).astype(jnp.float32)

    crit_soft2 = DistillationLossPallas(teacher_w2, teacher_b2, "soft", ALPHA, TAU)
    loss_soft2 = jax.block_until_ready(
        crit_soft2(inputs2, (outputs, outputs_kd), labels2))
    ref_soft2 = _reference(x_q2, outputs, outputs_kd, labels2, w_q2, teacher_b2,
                           ALPHA, TAU, mode="soft")
    np.testing.assert_allclose(np.asarray(loss_soft2), np.asarray(ref_soft2),
                               rtol=1e-4, atol=1e-4)

    print("KERNEL_OK")
</pallas_src>

<mosaic_0001>
module attributes {stable_mosaic.version = 11 : i64} {
  func.func @_fused_single_kernel(%arg0: memref<8xi32, #tpu.memory_space<smem>>, %arg1: memref<8x1024xbf16, #tpu.memory_space<vmem>>, %arg2: memref<1024x128xbf16, #tpu.memory_space<vmem>>, %arg3: memref<1x128xf32, #tpu.memory_space<vmem>>, %arg4: memref<8x128xf32, #tpu.memory_space<vmem>>, %arg5: memref<8x128xf32, #tpu.memory_space<vmem>>, %arg6: memref<1x1xf32, #tpu.memory_space<smem>>) attributes {dimension_semantics = [], scalar_prefetch = 0 : i64, scratch_operands = 0 : i64, tpu.core_type = #tpu.core_type<tc>} {
    %c0 = arith.constant 0 : index
    %c0_0 = arith.constant 0 : index
    %0 = vector.load %arg1[%c0, %c0_0] : memref<8x1024xbf16, #tpu.memory_space<vmem>>, vector<8x1024xbf16>
    %c0_1 = arith.constant 0 : index
    %c0_2 = arith.constant 0 : index
    %1 = vector.load %arg2[%c0_1, %c0_2] : memref<1024x128xbf16, #tpu.memory_space<vmem>>, vector<1024x128xbf16>
    %cst = arith.constant dense<0.000000e+00> : vector<8x128xf32>
    %2 = tpu.matmul %0, %1, %cst {dimension_numbers = #tpu.dot_dimension_numbers<[1], [0], [0], [1], [0, 0, 1, 1], [], []>} : vector<8x1024xbf16>, vector<1024x128xbf16>, vector<8x128xf32> -> vector<8x128xf32>
    %c0_3 = arith.constant 0 : index
    %c0_4 = arith.constant 0 : index
    %3 = vector.load %arg3[%c0_3, %c0_4] : memref<1x128xf32, #tpu.memory_space<vmem>>, vector<1x128xf32>
    %4 = vector.broadcast %3 : vector<1x128xf32> to vector<8x128xf32>
    %5 = arith.addf %2, %4 : vector<8x128xf32>
    %c0_5 = arith.constant 0 : index
    %c0_6 = arith.constant 0 : index
    %6 = vector.load %arg4[%c0_5, %c0_6] : memref<8x128xf32, #tpu.memory_space<vmem>>, vector<8x128xf32>
    %cst_7 = arith.constant dense<0xFF800000> : vector<8xf32>
    %7 = vector.multi_reduction <maximumf>, %6, %cst_7 [1] : vector<8x128xf32> to vector<8xf32>
    %8 = vector.shape_cast %7 : vector<8xf32> to vector<8x1xf32>
    %9 = vector.broadcast %8 : vector<8x1xf32> to vector<8x128xf32>
    %10 = arith.subf %6, %9 : vector<8x128xf32>
    %11 = math.exp %10 : vector<8x128xf32>
    %cst_8 = arith.constant dense<0.000000e+00> : vector<8xf32>
    %12 = vector.multi_reduction <add>, %11, %cst_8 [1] : vector<8x128xf32> to vector<8xf32>
    %13 = vector.shape_cast %12 : vector<8xf32> to vector<8x1xf32>
    %14 = math.log %13 : vector<8x1xf32>
    %15 = vector.broadcast %14 : vector<8x1xf32> to vector<8x128xf32>
    %16 = arith.subf %10, %15 : vector<8x128xf32>
    %17 = tpu.iota {dimensions = array<i32: 1>} : vector<1x128xi32>
    %18 = vector.extract_strided_slice %16 {offsets = [0, 0], sizes = [1, 128], strides = [1, 1]} : vector<8x128xf32> to vector<1x128xf32>
    %c0_9 = arith.constant 0 : index
    %19 = memref.load %arg0[%c0_9] : memref<8xi32, #tpu.memory_space<smem>>
    %20 = vector.broadcast %19 : i32 to vector<1x128xi32>
    %21 = arith.cmpi eq, %17, %20 : vector<1x128xi32>
    %cst_10 = arith.constant 0.000000e+00 : f32
    %22 = vector.broadcast %cst_10 : f32 to vector<1x128xf32>
    %23 = arith.select %21, %18, %22 : vector<1x128xi1>, vector<1x128xf32>
    %24 = vector.shape_cast %23 : vector<1x128xf32> to vector<1x1x128xf32>
    %cst_11 = arith.constant dense<0.000000e+00> : vector<1xf32>
    %25 = vector.multi_reduction <add>, %24, %cst_11 [1, 2] : vector<1x1x128xf32> to vector<1xf32>
    %26 = vector.shape_cast %25 : vector<1xf32> to vector<1x1x1xf32>
    %27 = vector.extract %26[0, 0, 0] : f32 from vector<1x1x1xf32>
    %cst_12 = arith.constant 0.000000e+00 : f32
    %28 = arith.subf %cst_12, %27 : f32
    %29 = vector.extract_strided_slice %16 {offsets = [1, 0], sizes = [1, 128], strides = [1, 1]} : vector<8x128xf32> to vector<1x128xf32>
    %c1 = arith.constant 1 : index
    %30 = memref.load %arg0[%c1] : memref<8xi32, #tpu.memory_space<smem>>
    %31 = vector.broadcast %30 : i32 to vector<1x128xi32>
    %32 = arith.cmpi eq, %17, %31 : vector<1x128xi32>
    %cst_13 = arith.constant 0.000000e+00 : f32
    %33 = vector.broadcast %cst_13 : f32 to vector<1x128xf32>
    %34 = arith.select %32, %29, %33 : vector<1x128xi1>, vector<1x128xf32>
    %35 = vector.shape_cast %34 : vector<1x128xf32> to vector<1x1x128xf32>
    %cst_14 = arith.constant dense<0.000000e+00> : vector<1xf32>
    %36 = vector.multi_reduction <add>, %35, %cst_14 [1, 2] : vector<1x1x128xf32> to vector<1xf32>
    %37 = vector.shape_cast %36 : vector<1xf32> to vector<1x1x1xf32>
    %38 = vector.extract %37[0, 0, 0] : f32 from vector<1x1x1xf32>
    %39 = arith.subf %28, %38 : f32
    %40 = vector.extract_strided_slice %16 {offsets = [2, 0], sizes = [1, 128], strides = [1, 1]} : vector<8x128xf32> to vector<1x128xf32>
    %c2 = arith.constant 2 : index
    %41 = memref.load %arg0[%c2] : memref<8xi32, #tpu.memory_space<smem>>
    %42 = vector.broadcast %41 : i32 to vector<1x128xi32>
    %43 = arith.cmpi eq, %17, %42 : vector<1x128xi32>
    %cst_15 = arith.constant 0.000000e+00 : f32
    %44 = vector.broadcast %cst_15 : f32 to vector<1x128xf32>
    %45 = arith.select %43, %40, %44 : vector<1x128xi1>, vector<1x128xf32>
    %46 = vector.shape_cast %45 : vector<1x128xf32> to vector<1x1x128xf32>
    %cst_16 = arith.constant dense<0.000000e+00> : vector<1xf32>
    %47 = vector.multi_reduction <add>, %46, %cst_16 [1, 2] : vector<1x1x128xf32> to vector<1xf32>
    %48 = vector.shape_cast %47 : vector<1xf32> to vector<1x1x1xf32>
    %49 = vector.extract %48[0, 0, 0] : f32 from vector<1x1x1xf32>
    %50 = arith.subf %39, %49 : f32
    %51 = vector.extract_strided_slice %16 {offsets = [3, 0], sizes = [1, 128], strides = [1, 1]} : vector<8x128xf32> to vector<1x128xf32>
    %c3 = arith.constant 3 : index
    %52 = memref.load %arg0[%c3] : memref<8xi32, #tpu.memory_space<smem>>
    %53 = vector.broadcast %52 : i32 to vector<1x128xi32>
    %54 = arith.cmpi eq, %17, %53 : vector<1x128xi32>
    %cst_17 = arith.constant 0.000000e+00 : f32
    %55 = vector.broadcast %cst_17 : f32 to vector<1x128xf32>
    %56 = arith.select %54, %51, %55 : vector<1x128xi1>, vector<1x128xf32>
    %57 = vector.shape_cast %56 : vector<1x128xf32> to vector<1x1x128xf32>
    %cst_18 = arith.constant dense<0.000000e+00> : vector<1xf32>
    %58 = vector.multi_reduction <add>, %57, %cst_18 [1, 2] : vector<1x1x128xf32> to vector<1xf32>
    %59 = vector.shape_cast %58 : vector<1xf32> to vector<1x1x1xf32>
    %60 = vector.extract %59[0, 0, 0] : f32 from vector<1x1x1xf32>
    %61 = arith.subf %50, %60 : f32
    %62 = vector.extract_strided_slice %16 {offsets = [4, 0], sizes = [1, 128], strides = [1, 1]} : vector<8x128xf32> to vector<1x128xf32>
    %c4 = arith.constant 4 : index
    %63 = memref.load %arg0[%c4] : memref<8xi32, #tpu.memory_space<smem>>
    %64 = vector.broadcast %63 : i32 to vector<1x128xi32>
    %65 = arith.cmpi eq, %17, %64 : vector<1x128xi32>
    %cst_19 = arith.constant 0.000000e+00 : f32
    %66 = vector.broadcast %cst_19 : f32 to vector<1x128xf32>
    %67 = arith.select %65, %62, %66 : vector<1x128xi1>, vector<1x128xf32>
    %68 = vector.shape_cast %67 : vector<1x128xf32> to vector<1x1x128xf32>
    %cst_20 = arith.constant dense<0.000000e+00> : vector<1xf32>
    %69 = vector.multi_reduction <add>, %68, %cst_20 [1, 2] : vector<1x1x128xf32> to vector<1xf32>
    %70 = vector.shape_cast %69 : vector<1xf32> to vector<1x1x1xf32>
    %71 = vector.extract %70[0, 0, 0] : f32 from vector<1x1x1xf32>
    %72 = arith.subf %61, %71 : f32
    %73 = vector.extract_strided_slice %16 {offsets = [5, 0], sizes = [1, 128], strides = [1, 1]} : vector<8x128xf32> to vector<1x128xf32>
    %c5 = arith.constant 5 : index
    %74 = memref.load %arg0[%c5] : memref<8xi32, #tpu.memory_space<smem>>
    %75 = vector.broadcast %74 : i32 to vector<1x128xi32>
    %76 = arith.cmpi eq, %17, %75 : vector<1x128xi32>
    %cst_21 = arith.constant 0.000000e+00 : f32
    %77 = vector.broadcast %cst_21 : f32 to vector<1x128xf32>
    %78 = arith.select %76, %73, %77 : vector<1x128xi1>, vector<1x128xf32>
    %79 = vector.shape_cast %78 : vector<1x128xf32> to vector<1x1x128xf32>
    %cst_22 = arith.constant dense<0.000000e+00> : vector<1xf32>
    %80 = vector.multi_reduction <add>, %79, %cst_22 [1, 2] : vector<1x1x128xf32> to vector<1xf32>
    %81 = vector.shape_cast %80 : vector<1xf32> to vector<1x1x1xf32>
    %82 = vector.extract %81[0, 0, 0] : f32 from vector<1x1x1xf32>
    %83 = arith.subf %72, %82 : f32
    %84 = vector.extract_strided_slice %16 {offsets = [6, 0], sizes = [1, 128], strides = [1, 1]} : vector<8x128xf32> to vector<1x128xf32>
    %c6 = arith.constant 6 : index
    %85 = memref.load %arg0[%c6] : memref<8xi32, #tpu.memory_space<smem>>
    %86 = vector.broadcast %85 : i32 to vector<1x128xi32>
    %87 = arith.cmpi eq, %17, %86 : vector<1x128xi32>
    %cst_23 = arith.constant 0.000000e+00 : f32
    %88 = vector.broadcast %cst_23 : f32 to vector<1x128xf32>
    %89 = arith.select %87, %84, %88 : vector<1x128xi1>, vector<1x128xf32>
    %90 = vector.shape_cast %89 : vector<1x128xf32> to vector<1x1x128xf32>
    %cst_24 = arith.constant dense<0.000000e+00> : vector<1xf32>
    %91 = vector.multi_reduction <add>, %90, %cst_24 [1, 2] : vector<1x1x128xf32> to vector<1xf32>
    %92 = vector.shape_cast %91 : vector<1xf32> to vector<1x1x1xf32>
    %93 = vector.extract %92[0, 0, 0] : f32 from vector<1x1x1xf32>
    %94 = arith.subf %83, %93 : f32
    %95 = vector.extract_strided_slice %16 {offsets = [7, 0], sizes = [1, 128], strides = [1, 1]} : vector<8x128xf32> to vector<1x128xf32>
    %c7 = arith.constant 7 : index
    %96 = memref.load %arg0[%c7] : memref<8xi32, #tpu.memory_space<smem>>
    %97 = vector.broadcast %96 : i32 to vector<1x128xi32>
    %98 = arith.cmpi eq, %17, %97 : vector<1x128xi32>
    %cst_25 = arith.constant 0.000000e+00 : f32
    %99 = vector.broadcast %cst_25 : f32 to vector<1x128xf32>
    %100 = arith.select %98, %95, %99 : vector<1x128xi1>, vector<1x128xf32>
    %101 = vector.shape_cast %100 : vector<1x128xf32> to vector<1x1x128xf32>
    %cst_26 = arith.constant dense<0.000000e+00> : vector<1xf32>
    %102 = vector.multi_reduction <add>, %101, %cst_26 [1, 2] : vector<1x1x128xf32> to vector<1xf32>
    %103 = vector.shape_cast %102 : vector<1xf32> to vector<1x1x1xf32>
    %104 = vector.extract %103[0, 0, 0] : f32 from vector<1x1x1xf32>
    %105 = arith.subf %94, %104 : f32
    %cst_27 = arith.constant 1.250000e-01 : f32
    %106 = arith.mulf %105, %cst_27 : f32
    %c0_28 = arith.constant 0 : index
    %c0_29 = arith.constant 0 : index
    %107 = vector.load %arg5[%c0_28, %c0_29] : memref<8x128xf32, #tpu.memory_space<vmem>>, vector<8x128xf32>
    %cst_30 = arith.constant 0.333333343 : f32
    %108 = vector.broadcast %cst_30 : f32 to vector<8x128xf32>
    %109 = arith.mulf %107, %108 : vector<8x128xf32>
    %cst_31 = arith.constant 0.333333343 : f32
    %110 = vector.broadcast %cst_31 : f32 to vector<8x128xf32>
    %111 = arith.mulf %5, %110 : vector<8x128xf32>
    %cst_32 = arith.constant dense<0xFF800000> : vector<8xf32>
    %112 = vector.multi_reduction <maximumf>, %109, %cst_32 [1] : vector<8x128xf32> to vector<8xf32>
    %113 = vector.shape_cast %112 : vector<8xf32> to vector<8x1xf32>
    %114 = vector.broadcast %113 : vector<8x1xf32> to vector<8x128xf32>
    %115 = arith.subf %109, %114 : vector<8x128xf32>
    %116 = math.exp %115 : vector<8x128xf32>
    %cst_33 = arith.constant dense<0.000000e+00> : vector<8xf32>
    %117 = vector.multi_reduction <add>, %116, %cst_33 [1] : vector<8x128xf32> to vector<8xf32>
    %118 = vector.shape_cast %117 : vector<8xf32> to vector<8x1xf32>
    %119 = math.log %118 : vector<8x1xf32>
    %120 = vector.broadcast %119 : vector<8x1xf32> to vector<8x128xf32>
    %121 = arith.subf %115, %120 : vector<8x128xf32>
    %cst_34 = arith.constant dense<0xFF800000> : vector<8xf32>
    %122 = vector.multi_reduction <maximumf>, %111, %cst_34 [1] : vector<8x128xf32> to vector<8xf32>
    %123 = vector.shape_cast %122 : vector<8xf32> to vector<8x1xf32>
    %124 = vector.broadcast %123 : vector<8x1xf32> to vector<8x128xf32>
    %125 = arith.subf %111, %124 : vector<8x128xf32>
    %126 = math.exp %125 : vector<8x128xf32>
    %cst_35 = arith.constant dense<0.000000e+00> : vector<8xf32>
    %127 = vector.multi_reduction <add>, %126, %cst_35 [1] : vector<8x128xf32> to vector<8xf32>
    %128 = vector.shape_cast %127 : vector<8xf32> to vector<8x1xf32>
    %129 = math.log %128 : vector<8x1xf32>
    %130 = vector.broadcast %129 : vector<8x1xf32> to vector<8x128xf32>
    %131 = arith.subf %125, %130 : vector<8x128xf32>
    %132 = arith.subf %131, %121 : vector<8x128xf32>
    %133 = arith.mulf %126, %132 : vector<8x128xf32>
    %cst_36 = arith.constant dense<0.000000e+00> : vector<8xf32>
    %134 = vector.multi_reduction <add>, %133, %cst_36 [1] : vector<8x128xf32> to vector<8xf32>
    %135 = vector.shape_cast %134 : vector<8xf32> to vector<8x1xf32>
    %136 = arith.divf %135, %128 : vector<8x1xf32>
    %137 = vector.shape_cast %136 : vector<8x1xf32> to vector<1x8x1xf32>
    %cst_37 = arith.constant dense<0.000000e+00> : vector<1xf32>
    %138 = vector.multi_reduction <add>, %137, %cst_37 [1, 2] : vector<1x8x1xf32> to vector<1xf32>
    %139 = vector.shape_cast %138 : vector<1xf32> to vector<1x1x1xf32>
    %140 = vector.extract %139[0, 0, 0] : f32 from vector<1x1x1xf32>
    %cst_38 = arith.constant 9.000000e+00 : f32
    %141 = arith.mulf %140, %cst_38 : f32
    %cst_39 = arith.constant 9.765625E-4 : f32
    %142 = arith.mulf %141, %cst_39 : f32
    %cst_40 = arith.constant 5.000000e-01 : f32
    %143 = arith.mulf %106, %cst_40 : f32
    %cst_41 = arith.constant 5.000000e-01 : f32
    %144 = arith.mulf %142, %cst_41 : f32
    %145 = arith.addf %143, %144 : f32
    %c0_42 = arith.constant 0 : index
    %c0_43 = arith.constant 0 : index
    %146 = memref.load %arg6[%c0_42, %c0_43] : memref<1x1xf32, #tpu.memory_space<smem>>
    memref.store %145, %arg6[%c0_42, %c0_43] : memref<1x1xf32, #tpu.memory_space<smem>>
    return
  }
}

</mosaic_0001>

<bundles_post_ra>
// kernel: tpu_custom_call.1
= control target key start
LH: loop header
LB: loop body
LE: loop exit
PB: predicated region body
PF: predicated region fallthrough
CT: control target
= control target key end

     0   :  { %11 = vsyncpa [#allocation4], 0  ;;  %s1576_s0 = inlined_call_operand.hbm [shape: s32[8], index: 0, kind: input, shape index: {}]   ;;  %s1577_s1 = inlined_call_operand.hbm [shape: bf16[8,1024], index: 1, kind: input, shape index: {}]   ;;  %s1578_s2 = inlined_call_operand.hbm [shape: bf16[1024,128], index: 2, kind: input, shape index: {}]   ;;  %s1579_s3 = inlined_call_operand.vmem [shape: f32[1,128], index: 3, kind: input, shape index: {}]   ;;  %s1580_s4 = inlined_call_operand.hbm [shape: f32[8,128], index: 4, kind: input, shape index: {}]   ;;  %s1581_s5 = inlined_call_operand.hbm [shape: f32[8,128], index: 5, kind: input, shape index: {}]   ;;  %s1582_s6 = inlined_call_operand.hbm [shape: f32[1,1], index: 6, kind: output, shape index: {}]  }
   0x1   :  { %12 = vsyncpa [#allocation3], 0 }
   0x2   :  { %13 = vsyncpa [#allocation8], 0 }
   0x3   :  { %14 = vsyncpa [#allocation11], 0  ;;  %s40_s23 = sshll.u32 %s1578_s2, 4  ;;  %s41_s23 = int_to_ptr.hbm [resolvable:$true] %s40_s23 }
   0x4   :  { %15 = vsyncpa [#allocation5], 0  ;;  %s1479_s24 = smov [#allocation7]   ;;  %s21_s28 = sshll.u32 %s1576_s0, 4  ;;  %s22_s28 = int_to_ptr.hbm [resolvable:$true] %s21_s28 }
   0x5   :  { %s42_s25 = sshll.u32 %s1479_s24, 4  ;;  %s1480_s29 = smov 64   ;;  %s43_s25 = int_to_ptr.vmem [resolvable:$true] %s42_s25 }
   0x6   :  { %s1481_s30 = smov 4   ;;  %s1482_s7 = smov [#allocation2]  }
   0x7   :  { %48 = dma.hbm_to_vmem [thread:$0]  %s41_s23, 8192, %s43_s25, [#allocation8], %s1480_s29, %s1480_s29, %s1481_s30  }
   0x8   :  { %24 = dma.hbm_to_smem %s22_s28, 16, %s1482_s7, [#allocation4]  }
   0x9   :  { %s30_s10 = sshll.u32 %s1577_s1, 4  ;;  %s1483_s2 = smov [#allocation6]   ;;  %s31_s10 = int_to_ptr.hbm [resolvable:$true] %s30_s10 }
   0xa   :  { %s32_s11 = sshll.u32 %s1483_s2, 4  ;;  %s56_s14 = sshll.u32 %s1580_s4, 4  ;;  %s33_s11 = int_to_ptr.vmem [resolvable:$true] %s32_s11  ;;  %s57_s14 = int_to_ptr.hbm [resolvable:$true] %s56_s14 }
   0xb   :  { %35 = dma.hbm_to_vmem [thread:$0]  %s31_s10, 512, %s33_s11, [#allocation3]  }
   0xc   :  { %s1484_s0 = smov [#allocation9]   ;;  %s67_s18 = sshll.u32 %s1581_s5, 4  ;;  %s68_s18 = int_to_ptr.hbm [resolvable:$true] %s67_s18 }
   0xd   :  { %s58_s15 = sshll.u32 %s1484_s0, 4  ;;  %s1485_s1 = smov [#allocation10]   ;;  %s59_s15 = int_to_ptr.vmem [resolvable:$true] %s58_s15 }
   0xe   :  { %61 = dma.hbm_to_vmem [thread:$0]  %s57_s14, 128, %s59_s15, [#allocation8]  }
   0xf   :  { %s69_s19 = sshll.u32 %s1485_s1, 4  ;;  %s70_s19 = int_to_ptr.vmem [resolvable:$true] %s69_s19 }
  0x10   :  { %72 = dma.hbm_to_vmem [thread:$0]  %s68_s18, 128, %s70_s19, [#allocation11]  }
  0x11   :  { %1469 = dma.done.wait [#allocation4], 16  }
  0x12   :  { %1470 = vsyncadd [#allocation4], 4294967280 }
  0x13   :  { %1471 = dma.done.wait [#allocation3], 512  }
  0x14   :  { %1472 = vsyncadd [#allocation3], 4294966784 }
  0x15   :  { %1473 = dma.done.wait [#allocation8], 8320  }
  0x16   :  { %1474 = vsyncadd [#allocation8], 4294958976 }
  0x17   :  { %1475 = dma.done.wait [#allocation11], 128  }
  0x18   :  { %1476 = vsyncadd [#allocation11], 4294967168 }
  0x19   :  { %93 = sfence }
  0x1a   :  { %v1251_v0 = vld [vmem:[#allocation7 + $0x38] sm:$0xff]  ;;  %v1250_v4 = vld [vmem:[#allocation7 + $0x30] sm:$0xff]  ;;  %v1249_v8 = vld [vmem:[#allocation7 + $0x28] sm:$0xff]  ;;  %s1238_s20 = sld [smem:[#allocation2 + $0x2]]  ;;  %vm763_vm3 = vcmask 1040384   ;;  %vm944_vm13 = vcmask 7168  }
  0x1b   :  { %v1259_v1 = vld [vmem:[#allocation7 + $0x78] sm:$0xff]  ;;  %642 = vmatpush.bf16.msra.mxu0 %v1251_v0  ;;  %v1258_v5 = vld [vmem:[#allocation7 + $0x70] sm:$0xff]  ;;  %v1257_v9 = vld [vmem:[#allocation7 + $0x68] sm:$0xff]  ;;  %s1237_s21 = sld [smem:[#allocation2 + $0x1]] }
  0x1c   :  { %v1267_v2 = vld [vmem:[#allocation7 + $0xb8] sm:$0xff]  ;;  %655 = vmatpush.bf16.msra.mxu1 %v1259_v1  ;;  %v1266_v6 = vld [vmem:[#allocation7 + $0xb0] sm:$0xff]  ;;  %v1265_v10 = vld [vmem:[#allocation7 + $0xa8] sm:$0xff]  ;;  %s1239_s22 = sld [smem:[#allocation2 + $0x3]] }
  0x1d   :  { %v1275_v3 = vld [vmem:[#allocation7 + $0xf8] sm:$0xff]  ;;  %668 = vmatpush.bf16.msra.mxu2 %v1267_v2  ;;  %v1274_v7 = vld [vmem:[#allocation7 + $0xf0] sm:$0xff]  ;;  %v1273_v11 = vld [vmem:[#allocation7 + $0xe8] sm:$0xff]  ;;  %s1240_s23 = sld [smem:[#allocation2 + $0x4]] }
  0x1e   :  { %681 = vmatpush.bf16.msra.mxu3 %v1275_v3  ;;  %v1248_v12 = vld [vmem:[#allocation7 + $0x20] sm:$0xff]  ;;  %v1247_v16 = vld [vmem:[#allocation7 + $0x18] sm:$0xff]  ;;  %v1246_v20 = vld [vmem:[#allocation7 + $0x10] sm:$0xff]  ;;  %s1241_s24 = sld [smem:[#allocation2 + $0x5]] }
  0x1f   :  { %643 = vmatpush.bf16.msra.mxu0 %v1250_v4  ;;  %v1256_v13 = vld [vmem:[#allocation7 + $0x60] sm:$0xff]  ;;  %v1255_v17 = vld [vmem:[#allocation7 + $0x58] sm:$0xff]  ;;  %v1254_v21 = vld [vmem:[#allocation7 + $0x50] sm:$0xff]  ;;  %s1551_s25 = sld [smem:[#allocation2 + $0x6]] }
  0x20   :  { %656 = vmatpush.bf16.msra.mxu1 %v1258_v5  ;;  %v1264_v14 = vld [vmem:[#allocation7 + $0xa0] sm:$0xff]  ;;  %v1263_v18 = vld [vmem:[#allocation7 + $0x98] sm:$0xff]  ;;  %v1262_v22 = vld [vmem:[#allocation7 + $0x90] sm:$0xff]  ;;  %s1243_s26 = sld [smem:[#allocation2 + $0x7]] }
  0x21   :  { %669 = vmatpush.bf16.msra.mxu2 %v1266_v6  ;;  %v1272_v15 = vld [vmem:[#allocation7 + $0xe0] sm:$0xff]  ;;  %v1271_v19 = vld [vmem:[#allocation7 + $0xd8] sm:$0xff]  ;;  %v1270_v23 = vld [vmem:[#allocation7 + $0xd0] sm:$0xff] }
  0x22   :  { %682 = vmatpush.bf16.msra.mxu3 %v1274_v7  ;;  %v1245_v24 = vld [vmem:[#allocation7 + $0x8] sm:$0xff]  ;;  %v94_v29 = vld [vmem:[#allocation6] sm:$0xff]  ;;  %v1283_v40 = vld [vmem:[#allocation7 + $0x138] sm:$0xff] }
  0x23   :  { %644 = vmatpush.bf16.msra.mxu0 %v1249_v8  ;;  %v1253_v25 = vld [vmem:[#allocation7 + $0x48] sm:$0xff]  ;;  %v1244_v31 = vld [vmem:[#allocation7] sm:$0xff]  ;;  %v234_v34 = vunpack.c.l.b16 %v94_v29  ;;  %v235_v39 = vunpack.c.h.b16 %v94_v29  ;;  %v1291_v41 = vld [vmem:[#allocation7 + $0x178] sm:$0xff] }
  0x24   :  { %657 = vmatpush.bf16.msra.mxu1 %v1257_v9  ;;  %v1261_v26 = vld [vmem:[#allocation7 + $0x88] sm:$0xff]  ;;  %v1252_v32 = vld [vmem:[#allocation7 + $0x40] sm:$0xff]  ;;  %v1299_v42 = vld [vmem:[#allocation7 + $0x1b8] sm:$0xff] }
  0x25   :  { %670 = vmatpush.bf16.msra.mxu2 %v1265_v10  ;;  %v1269_v27 = vld [vmem:[#allocation7 + $0xc8] sm:$0xff]  ;;  %v1260_v36 = vld [vmem:[#allocation7 + $0x80] sm:$0xff]  ;;  %v1307_v43 = vld [vmem:[#allocation7 + $0x1f8] sm:$0xff]  ;;  %v242_v45 = vpack.c.b16 %v234_v34, %v234_v34  ;;  %v243_v47 = vpack.c.b16 %v235_v39, %v235_v39 }
  0x26   :  { %683 = vmatpush.bf16.msra.mxu3 %v1273_v11  ;;  %v95_v28 = vld [vmem:[#allocation6 + $0x8] sm:$0xff]  ;;  %v1268_v37 = vld [vmem:[#allocation7 + $0xc0] sm:$0xff]  ;;  %v1282_v48 = vld [vmem:[#allocation7 + $0x130] sm:$0xff] }
  0x27   :  { %645 = vmatpush.bf16.msra.mxu0 %v1248_v12  ;;  %v902_v30 = vld [vmem:[#allocation10] sm:$0xff]  ;;  %v236_v33 = vunpack.c.l.b16 %v95_v28  ;;  %v237_v38 = vunpack.c.h.b16 %v95_v28  ;;  %v1290_v49 = vld [vmem:[#allocation7 + $0x170] sm:$0xff]  ;;  %v1280_v56 = vld [vmem:[#allocation7 + $0x120] sm:$0xff] }
  0x28   :  { %658 = vmatpush.bf16.msra.mxu1 %v1256_v13  ;;  %v1537_v35 = vmul.f32 0.33333334, %v902_v30  ;;  %v1298_v50 = vld [vmem:[#allocation7 + $0x1b0] sm:$0xff]  ;;  %v1281_v52 = vld [vmem:[#allocation7 + $0x128] sm:$0xff]  ;;  %v1288_v57 = vld [vmem:[#allocation7 + $0x160] sm:$0xff] }
  0x29   :  { %671 = vmatpush.bf16.msra.mxu2 %v1264_v14  ;;  %v244_v44 = vpack.c.b16 %v236_v33, %v236_v33  ;;  %v245_v46 = vpack.c.b16 %v237_v38, %v237_v38  ;;  %v1306_v51 = vld [vmem:[#allocation7 + $0x1f0] sm:$0xff]  ;;  %v1289_v53 = vld [vmem:[#allocation7 + $0x168] sm:$0xff]  ;;  %v1296_v58 = vld [vmem:[#allocation7 + $0x1a0] sm:$0xff] }
  0x2a   :  { %684 = vmatpush.bf16.msra.mxu3 %v1272_v15  ;;  %905 = vmax.xlane.f32.xlu0 %v1537_v35  ;;  %v1297_v54 = vld [vmem:[#allocation7 + $0x1a8] sm:$0xff]  ;;  %v1304_v59 = vld [vmem:[#allocation7 + $0x1e0] sm:$0xff]  ;;  %v1279_v60 = vld [vmem:[#allocation7 + $0x118] sm:$0xff] }
  0x2b   :  { %646 = vmatpush.bf16.msra.mxu0 %v1247_v16  ;;  %v1305_v55 = vld [vmem:[#allocation7 + $0x1e8] sm:$0xff]  ;;  %v1287_v61 = vld [vmem:[#allocation7 + $0x158] sm:$0xff]  ;;  %v1278_v0 = vld [vmem:[#allocation7 + $0x110] sm:$0xff] }
  0x2c   :  { %659 = vmatpush.bf16.msra.mxu1 %v1255_v17  ;;  %v1295_v62 = vld [vmem:[#allocation7 + $0x198] sm:$0xff]  ;;  %v1286_v1 = vld [vmem:[#allocation7 + $0x150] sm:$0xff]  ;;  %v1277_v4 = vld [vmem:[#allocation7 + $0x108] sm:$0xff] }
  0x2d   :  { %672 = vmatpush.bf16.msra.mxu2 %v1263_v18  ;;  %v1303_v63 = vld [vmem:[#allocation7 + $0x1d8] sm:$0xff]  ;;  %v1294_v2 = vld [vmem:[#allocation7 + $0x190] sm:$0xff]  ;;  %v1285_v5 = vld [vmem:[#allocation7 + $0x148] sm:$0xff] }
  0x2e   :  { %685 = vmatpush.bf16.msra.mxu3 %v1271_v19  ;;  %v1302_v3 = vld [vmem:[#allocation7 + $0x1d0] sm:$0xff]  ;;  %v1293_v7 = vld [vmem:[#allocation7 + $0x188] sm:$0xff]  ;;  %v97_v9 = vld [vmem:[#allocation6 + $0x18] sm:$0xff] }
  0x2f   :  { %647 = vmatpush.bf16.msra.mxu0 %v1246_v20  ;;  %v96_v6 = vld [vmem:[#allocation6 + $0x10] sm:$0xff]  ;;  %v1301_v8 = vld [vmem:[#allocation7 + $0x1c8] sm:$0xff]  ;;  %v1276_v12 = vld [vmem:[#allocation7 + $0x100] sm:$0xff]  ;;  %v240_v14 = vunpack.c.l.b16 %v97_v9  ;;  %v241_v15 = vunpack.c.h.b16 %v97_v9 }
  0x30   :  { %660 = vmatpush.bf16.msra.mxu1 %v1254_v21  ;;  %v238_v10 = vunpack.c.l.b16 %v96_v6  ;;  %v239_v11 = vunpack.c.h.b16 %v96_v6  ;;  %v1284_v13 = vld [vmem:[#allocation7 + $0x140] sm:$0xff] }
  0x31   :  { %673 = vmatpush.bf16.msra.mxu2 %v1262_v22  ;;  %v1292_v16 = vld [vmem:[#allocation7 + $0x180] sm:$0xff]  ;;  %v248_v20 = vpack.c.b16 %v240_v14, %v240_v14  ;;  %v249_v21 = vpack.c.b16 %v241_v15, %v241_v15  ;;  %v812_v15 = vstv %s1239_s22 }
  0x32   :  { %686 = vmatpush.bf16.msra.mxu3 %v1270_v23  ;;  %v1300_v17 = vld [vmem:[#allocation7 + $0x1c0] sm:$0xff]  ;;  %v246_v18 = vpack.c.b16 %v238_v10, %v238_v10  ;;  %v247_v19 = vpack.c.b16 %v239_v11, %v239_v11  ;;  %v794_v10 = vstv %s1238_s20  ;;  %v776_v11 = vstv %s1237_s21  ;;  %s967_s20 = sshll.u32 %s1582_s6, 4  ;;  %s968_s20 = int_to_ptr.hbm [resolvable:$true] %s967_s20 }
  0x33   :  { %648 = vmatpush.bf16.msra.mxu0 %v1245_v24  ;;  %v746_v22 = vld [vmem:[#allocation9] sm:$0xff] }
  0x34   :  { %661 = vmatpush.bf16.msra.mxu1 %v1253_v25  ;;  %747 = vmax.xlane.f32.xlu1 %v746_v22  ;;  %v1334_v33 = vld [vmem:[%s1579_s3] ss:$0 sm:$0xff]  ;;  %s759_s3 = sld [smem:[#allocation2]] }
  0x35   :  { %674 = vmatpush.bf16.msra.mxu2 %v1261_v26 }
  0x36   :  { %687 = vmatpush.bf16.msra.mxu3 %v1269_v27 }
  0x37   :  { %649 = vmatpush.bf16.msra.mxu0 %v1244_v31 }
  0x38   :  { %662 = vmatpush.bf16.msra.mxu1 %v1252_v32 }
  0x39   :  { %675 = vmatpush.bf16.msra.mxu2 %v1260_v36 }
  0x3a   :  { %688 = vmatpush.bf16.msra.mxu3 %v1268_v37  ;;  %650 = vmatmul.bf16.vlgmr.msra.gmra.mxu0 %v242_v45  ;;  %v760_v9 = vstv %s759_s3 }
  0x3b   :  { %694 = vmatpush.bf16.msrb.mxu0 %v1283_v40  ;;  %663 = vmatmul.bf16.vlgmr.msra.gmra.mxu1 %v243_v47 }
  0x3c   :  { %707 = vmatpush.bf16.msrb.mxu1 %v1291_v41  ;;  %676 = vmatmul.bf16.vlgmr.msra.gmra.mxu2 %v244_v44 }
  0x3d   :  { %720 = vmatpush.bf16.msrb.mxu2 %v1299_v42  ;;  %689 = vmatmul.bf16.vlgmr.msra.gmra.mxu3 %v245_v46 }
  0x3e   :  { %733 = vmatpush.bf16.msrb.mxu3 %v1307_v43 }
  0x3f   :  { %695 = vmatpush.bf16.msrb.mxu0 %v1282_v48 }
  0x40   :  { %708 = vmatpush.bf16.msrb.mxu1 %v1290_v49 }
  0x41   :  { %721 = vmatpush.bf16.msrb.mxu2 %v1298_v50 }
  0x42   :  { %734 = vmatpush.bf16.msrb.mxu3 %v1306_v51 }
  0x43   :  { %696 = vmatpush.bf16.msrb.mxu0 %v1281_v52 }
  0x44   :  { %709 = vmatpush.bf16.msrb.mxu1 %v1289_v53 }
  0x45   :  { %722 = vmatpush.bf16.msrb.mxu2 %v1297_v54 }
  0x46   :  { %735 = vmatpush.bf16.msrb.mxu3 %v1305_v55 }
  0x47   :  { %697 = vmatpush.bf16.msrb.mxu0 %v1280_v56 }
  0x48   :  { %710 = vmatpush.bf16.msrb.mxu1 %v1288_v57 }
  0x49   :  { %723 = vmatpush.bf16.msrb.mxu2 %v1296_v58 }
  0x4a   :  { %736 = vmatpush.bf16.msrb.mxu3 %v1304_v59 }
  0x4b   :  { %698 = vmatpush.bf16.msrb.mxu0 %v1279_v60 }
  0x4c   :  { %711 = vmatpush.bf16.msrb.mxu1 %v1287_v61 }
  0x4d   :  { %724 = vmatpush.bf16.msrb.mxu2 %v1295_v62 }
  0x4e   :  { %737 = vmatpush.bf16.msrb.mxu3 %v1303_v63 }
  0x4f   :  { %699 = vmatpush.bf16.msrb.mxu0 %v1278_v0 }
  0x50   :  { %712 = vmatpush.bf16.msrb.mxu1 %v1286_v1 }
  0x51   :  { %725 = vmatpush.bf16.msrb.mxu2 %v1294_v2 }
  0x52   :  { %738 = vmatpush.bf16.msrb.mxu3 %v1302_v3 }
  0x53   :  { %700 = vmatpush.bf16.msrb.mxu0 %v1277_v4  ;;  %v757_v4 = vlaneseq }
  0x54   :  { %713 = vmatpush.bf16.msrb.mxu1 %v1285_v5 }
  0x55   :  { %726 = vmatpush.bf16.msrb.mxu2 %v1293_v7 }
  0x56   :  { %739 = vmatpush.bf16.msrb.mxu3 %v1301_v8  ;;  %v758_v8 = vand.u32 127, %v757_v4 }
  0x57   :  { %701 = vmatpush.bf16.msrb.mxu0 %v1276_v12 }
  0x58   :  { %714 = vmatpush.bf16.msrb.mxu1 %v1284_v13  ;;  %vm761_vm0 = vcmp.eq.s32.totalorder %v758_v8, %v760_v9  ;;  %vm795_vm1 = vcmp.eq.s32.totalorder %v758_v8, %v794_v10  ;;  %vm777_vm2 = vcmp.eq.s32.totalorder %v758_v8, %v776_v11  ;;  %vm1553_vm4 = vcmp.eq.s32.totalorder %v758_v8, %v812_v15 }
  0x59   :  { %727 = vmatpush.bf16.msrb.mxu2 %v1292_v16 }
  0x5a   :  { %740 = vmatpush.bf16.msrb.mxu3 %v1300_v17  ;;  %702 = vmatmul.bf16.vlgmr.msrb.gmra.mxu0 %v246_v18  ;;  %v830_v17 = vstv %s1240_s23  ;;  %s1486_s23 = smov [#allocation12]  }
  0x5b   :  { %715 = vmatmul.bf16.vlgmr.msrb.gmra.mxu1 %v247_v19  ;;  %v848_v19 = vstv %s1241_s24  ;;  %vm831_vm5 = vcmp.eq.s32.totalorder %v758_v8, %v830_v17 }
  0x5c   :  { %728 = vmatmul.bf16.vlgmr.msrb.gmra.mxu2 %v248_v20  ;;  %vm849_vm6 = vcmp.eq.s32.totalorder %v758_v8, %v848_v19 }
  0x5d   :  { %741 = vmatmul.bf16.vlgmr.msrb.gmra.mxu3 %v249_v21 }
  0x9d   :  { %v906_v23 = vpop.xlane.xlu0 %905 }
  0x9e   :  { %v1541_v24 = vsub.f32 %v1537_v35, %v906_v23 }
  0xa0   :  { %v908_v25 = vmul.f32 1.442695, %v1541_v24 }
  0xa2   :  { %1335 = vpow2.f32 %v908_v25 }
  0xa7   :  { %v748_v55 = vpop.xlane.xlu1 %747 }
  0xa8   :  { %v1336_v26 = vpop.eup %1335  ;;  %v749_v56 = vsub.f32 %v746_v22, %v748_v55 }
  0xa9   :  { %910 = vadd.xlane.f32.xlu1 %v1336_v26 }
  0xaa   :  { %v750_v58 = vmul.f32 1.442695, %v749_v56 }
  0xb7   :  { %v651_v27 = vpop.f32.mrf.mxu0 }
  0xb8   :  { %v664_v28 = vpop.f32.mrf.mxu1  ;;  %v652_v37 = vadd.f32 %v1334_v33, %v651_v27  ;;  %v884_v33 = vstv %s1243_s26 }
  0xb9   :  { %vm885_vm8 = vcmp.eq.s32.totalorder %v758_v8, %v884_v33 }
  0xba   :  { %v665_v35 = vadd.f32 %v664_v28, %v652_v37 }
  0xbf   :  { %v677_v29 = vpop.f32.mrf.mxu2  ;;  %v653_v31 = vpop.f32.mrf.mxu0 }
  0xc0   :  { %v690_v30 = vpop.f32.mrf.mxu3  ;;  %v666_v32 = vpop.f32.mrf.mxu1  ;;  %v678_v38 = vadd.f32 %v677_v29, %v665_v35 }
  0xc2   :  { %v691_v39 = vadd.f32 %v690_v30, %v678_v38  ;;  %v866_v30 = vstv %s1551_s25 }
  0xc3   :  { %vm867_vm7 = vcmp.eq.s32.totalorder %v758_v8, %v866_v30 }
  0xc7   :  { %v679_v34 = vpop.f32.mrf.mxu2 }
  0xc8   :  { %v692_v36 = vpop.f32.mrf.mxu3 }
  0xd7   :  { %v703_v40 = vpop.f32.mrf.mxu0 }
  0xd8   :  { %v716_v41 = vpop.f32.mrf.mxu1  ;;  %v704_v42 = vadd.f32 %v703_v40, %v691_v39 }
  0xda   :  { %v717_v43 = vadd.f32 %v716_v41, %v704_v42 }
  0xdf   :  { %v729_v44 = vpop.f32.mrf.mxu2  ;;  %v705_v47 = vpop.f32.mrf.mxu0 }
  0xe0   :  { %v742_v45 = vpop.f32.mrf.mxu3  ;;  %v730_v46 = vadd.f32 %v729_v44, %v717_v43  ;;  %v718_v48 = vpop.f32.mrf.mxu1 }
  0xe2   :  { %v743_v49 = vadd.f32 %v742_v45, %v730_v46 }
  0xe4   :  { %v904_v50 = vmul.f32 0.33333334, %v743_v49 }
  0xe6   :  { %915 = vmax.xlane.f32.xlu0 %v904_v50 }
  0xe7   :  { %v731_v51 = vpop.f32.mrf.mxu2 }
  0xe8   :  { %v744_v52 = vpop.f32.mrf.mxu3 }
 0x11c   :  { %v911_v61 = vpop.xlane.xlu1 %910 }
 0x159   :  { %v916_v53 = vpop.xlane.xlu0 %915 }
 0x15a   :  { %v917_v54 = vsub.f32 %v904_v50, %v916_v53 }
 0x15c   :  { %v918_v57 = vmul.f32 1.442695, %v917_v54 }
 0x15e   :  { %1337 = vpow2.f32 %v918_v57 }
 0x15f   :  { %1339 = vpow2.f32 %v750_v58 }
 0x160   :  { %1341 = vlog2.f32 %v911_v61 }
 0x164   :  { %v1338_v59 = vpop.eup %1337 }
 0x165   :  { %920 = vadd.xlane.f32.xlu2 %v1338_v59  ;;  %v1340_v60 = vpop.eup %1339 }
 0x166   :  { %v1342_v63 = vpop.eup %1341 }
 0x167   :  { %v913_v0 = vmul.f32 0.6931472, %v1342_v63 }
 0x169   :  { %v914_v5 = vsub.f32 %v1541_v24, %v913_v0 }
 0x16d   :  { %752 = vadd.xlane.f32.xlu2 %v1340_v60 }
 0x1d8   :  { %v1547_v62 = vpop.xlane.xlu2 %920 }
 0x1d9   :  { %1343 = vlog2.f32 %v1547_v62  ;;  %v940_v50 = vand.u32 2147483648, %v1547_v62  ;;  %vm934_vm10 = vweird.f32 %v1547_v62  ;;  %v938_v51 = vand.u32 2147483647, %v1547_v62 }
 0x1db   :  { %v941_v53 = vor.u32 1.1754944e-38, %v940_v50  ;;  %vm939_vm12 = vcmp.eq.f32.partialorder %v938_v51, 8.507059e+37 }
 0x1df   :  { %v1344_v1 = vpop.eup %1343 }
 0x1e0   :  { %v753_v2 = vpop.xlane.xlu2 %752  ;;  %v923_v3 = vmul.f32 0.6931472, %v1344_v1 }
 0x1e1   :  { %1345 = vlog2.f32 %v753_v2 }
 0x1e2   :  { %v924_v6 = vsub.f32 %v917_v54, %v923_v3  ;;  %1347 = vrcp.f32 %v1547_v62 }
 0x1e4   :  { %v925_v7 = vsub.f32 %v924_v6, %v914_v5 }
 0x1e6   :  { %v926_v13 = vmul.f32 %v1338_v59, %v925_v7 }
 0x1e7   :  { %v1346_v12 = vpop.eup %1345 }
 0x1e8   :  { %v755_v14 = vmul.f32 0.6931472, %v1346_v12  ;;  %927 = vadd.xlane.f32.xlu0 %v926_v13  ;;  %v1348_v45 = vpop.eup %1347 }
 0x1e9   :  { %v930_v46 = vmul.f32 %v1348_v45, %v1547_v62  ;;  %vm935_vm9 = vweird.f32 %v1348_v45 }
 0x1ea   :  { %v756_v16 = vsub.f32 %v749_v56, %v755_v14  ;;  %vm936_vm11 = vmor %vm934_vm10, %vm935_vm9 }
 0x1eb   :  { %v931_v47 = vsub.f32 1.0, %v930_v46 }
 0x1ec   :  { %v762_v20 = vsel %vm761_vm0, %v756_v16, 0.0  ;;  %v796_v21 = vsel %vm795_vm1, %v756_v16, 0.0  ;;  %v778_v22 = vsel %vm777_vm2, %v756_v16, 0.0  ;;  %v814_v26 = vsel %vm1553_vm4, %v756_v16, 0.0 }
 0x1ed   :  { %v764_v23 = vsel %vm763_vm3, %v762_v20, 0.0  ;;  %v798_v24 = vrot.slane %v796_v21, 2  ;;  %v780_v25 = vrot.slane %v778_v22, 1  ;;  %v832_v29 = vsel %vm831_vm5, %v756_v16, 0.0 }
 0x1ee   :  { %765 = vadd.xlane.f32.xlu1 %v764_v23  ;;  %v816_v31 = vrot.slane %v814_v26, 3  ;;  %v850_v32 = vsel %vm849_vm6, %v756_v16, 0.0  ;;  %v834_v34 = vrot.slane %v832_v29, 4  ;;  %v868_v35 = vsel %vm867_vm7, %v756_v16, 0.0 }
 0x1ef   :  { %v800_v27 = vsel %vm763_vm3, %v798_v24, 0.0  ;;  %v782_v28 = vsel %vm763_vm3, %v780_v25, 0.0  ;;  %v852_v36 = vrot.slane %v850_v32, 5  ;;  %v886_v40 = vsel %vm885_vm8, %v756_v16, 0.0 }
 0x1f0   :  { %783 = vadd.xlane.f32.xlu2 %v782_v28  ;;  %801 = vadd.xlane.f32.xlu0 %v800_v27  ;;  %v818_v37 = vsel %vm763_vm3, %v816_v31, 0.0  ;;  %v836_v38 = vsel %vm763_vm3, %v834_v34, 0.0  ;;  %v870_v41 = vrot.slane %v868_v35, 6  ;;  %v888_v42 = vrot.slane %v886_v40, 7 }
 0x1f1   :  { %v854_v39 = vsel %vm763_vm3, %v852_v36, 0.0  ;;  %v932_v48 = vmul.f32 %v1348_v45, %v931_v47 }
 0x1f2   :  { %v872_v43 = vsel %vm763_vm3, %v870_v41, 0.0  ;;  %v890_v44 = vsel %vm763_vm3, %v888_v42, 0.0 }
 0x1f3   :  { %v933_v49 = vadd.f32 %v1348_v45, %v932_v48 }
 0x1f5   :  { %v937_v52 = vsel %vm936_vm11, %v1348_v45, %v933_v49 }
 0x1f6   :  { %819 = vadd.xlane.f32.xlu1 %v818_v37  ;;  %v942_v54 = vsel %vm939_vm12, %v941_v53, %v937_v52 }
 0x1f8   :  { %837 = vadd.xlane.f32.xlu2 %v836_v38  ;;  %855 = vadd.xlane.f32.xlu0 %v854_v39 }
 0x1fe   :  { %873 = vadd.xlane.f32.xlu1 %v872_v43 }
 0x200   :  { %891 = vadd.xlane.f32.xlu2 %v890_v44 }
 0x25b   :  { %v928_v55 = vpop.xlane.xlu0 %927 }
 0x25c   :  { %v943_v56 = vmul.f32 %v942_v54, %v928_v55 }
 0x25e   :  { %v945_v57 = vsel %vm944_vm13, %v943_v56, 0.0 }
 0x25f   :  { %946 = vadd.xlane.f32.xlu0 %v945_v57 }
 0x261   :  { %v766_v58 = vpop.xlane.xlu1 %765 }
 0x262   :  { %v767_v59 = vrot.slane %v766_v58, 4 }
 0x263   :  { %v784_v60 = vpop.xlane.xlu2 %783  ;;  %v802_v63 = vpop.xlane.xlu0 %801 }
 0x264   :  { %v768_v61 = vadd.f32 %v767_v59, %v766_v58  ;;  %v785_v0 = vrot.slane %v784_v60, 4  ;;  %v803_v1 = vrot.slane %v802_v63, 4 }
 0x266   :  { %v769_v2 = vrot.slane %v768_v61, 2  ;;  %v786_v3 = vadd.f32 %v785_v0, %v784_v60  ;;  %v804_v62 = vadd.f32 %v803_v1, %v802_v63 }
 0x268   :  { %v787_v4 = vrot.slane %v786_v3, 2  ;;  %v770_v5 = vadd.f32 %v769_v2, %v768_v61  ;;  %v805_v6 = vrot.slane %v804_v62, 2 }
 0x269   :  { %v820_v7 = vpop.xlane.xlu1 %819 }
 0x26a   :  { %v821_v8 = vrot.slane %v820_v7, 4  ;;  %v771_v9 = vrot.slane %v770_v5, 1  ;;  %v788_v10 = vadd.f32 %v787_v4, %v786_v3  ;;  %v806_v12 = vadd.f32 %v805_v6, %v804_v62 }
 0x26b   :  { %v838_v11 = vpop.xlane.xlu2 %837  ;;  %v856_v14 = vpop.xlane.xlu0 %855 }
 0x26c   :  { %v822_v13 = vadd.f32 %v821_v8, %v820_v7  ;;  %v839_v15 = vrot.slane %v838_v11, 4  ;;  %v772_v16 = vadd.f32 %v771_v9, %v770_v5  ;;  %v789_v17 = vrot.slane %v788_v10, 1 }
 0x26d   :  { %v857_v18 = vrot.slane %v856_v14, 4  ;;  %v807_v19 = vrot.slane %v806_v12, 1 }
 0x26e   :  { %v823_v20 = vrot.slane %v822_v13, 2  ;;  %v840_v21 = vadd.f32 %v839_v15, %v838_v11  ;;  %1308 = vpush %v772_v16  ;;  %v790_v22 = vadd.f32 %v789_v17, %v788_v10 }
 0x26f   :  { %v858_v23 = vadd.f32 %v857_v18, %v856_v14  ;;  %v808_v24 = vadd.f32 %v807_v19, %v806_v12 }
 0x270   :  { %v841_v25 = vrot.slane %v840_v21, 2  ;;  %1310 = vpush %v790_v22  ;;  %v824_v26 = vadd.f32 %v823_v20, %v822_v13 }
 0x271   :  { %v859_v27 = vrot.slane %v858_v23, 2  ;;  %1312 = vpush %v808_v24  ;;  %v874_v28 = vpop.xlane.xlu1 %873 }
 0x272   :  { %v875_v29 = vrot.slane %v874_v28, 4  ;;  %v825_v30 = vrot.slane %v824_v26, 1  ;;  %v842_v31 = vadd.f32 %v841_v25, %v840_v21 }
 0x273   :  { %v892_v32 = vpop.xlane.xlu2 %891  ;;  %v860_v33 = vadd.f32 %v859_v27, %v858_v23 }
 0x274   :  { %v876_v34 = vadd.f32 %v875_v29, %v874_v28  ;;  %v893_v36 = vrot.slane %v892_v32, 4  ;;  %v826_v37 = vadd.f32 %v825_v30, %v824_v26  ;;  %v843_v35 = vrot.slane %v842_v31, 1 }
 0x275   :  { %v861_v38 = vrot.slane %v860_v33, 1 }
 0x276   :  { %v877_v39 = vrot.slane %v876_v34, 2  ;;  %v894_v40 = vadd.f32 %v893_v36, %v892_v32  ;;  %1314 = vpush %v826_v37  ;;  %v844_v41 = vadd.f32 %v843_v35, %v842_v31 }
 0x277   :  { %v862_v42 = vadd.f32 %v861_v38, %v860_v33 }
 0x278   :  { %v878_v43 = vadd.f32 %v877_v39, %v876_v34  ;;  %v895_v44 = vrot.slane %v894_v40, 2  ;;  %1316 = vpush %v844_v41 }
 0x279   :  { %1318 = vpush %v862_v42 }
 0x27a   :  { %v896_v45 = vadd.f32 %v895_v44, %v894_v40  ;;  %v879_v46 = vrot.slane %v878_v43, 1 }
 0x27c   :  { %v880_v47 = vadd.f32 %v879_v46, %v878_v43  ;;  %v897_v48 = vrot.slane %v896_v45, 1 }
 0x27e   :  { %1320 = vpush %v880_v47  ;;  %v898_v49 = vadd.f32 %v897_v48, %v896_v45 }
 0x280   :  { %1322 = vpush %v898_v49 }
 0x29f   :  { %s1309_s27 = spop %1308 }
 0x2a0   :  { %s774_s28 = ssub.f32 0.0, %s1309_s27 }
 0x2a1   :  { %s1311_s29 = spop %1310 }
 0x2a2   :  { %s792_s30 = ssub.f32 %s774_s28, %s1311_s29  ;;  %s1313_s7 = spop %1312 }
 0x2a4   :  { %s810_s9 = ssub.f32 %s792_s30, %s1313_s7 }
 0x2a7   :  { %s1315_s8 = spop %1314 }
 0x2a8   :  { %s828_s10 = ssub.f32 %s810_s9, %s1315_s8 }
 0x2a9   :  { %s1317_s2 = spop %1316 }
 0x2aa   :  { %s846_s11 = ssub.f32 %s828_s10, %s1317_s2  ;;  %s1319_s12 = spop %1318 }
 0x2ac   :  { %s864_s14 = ssub.f32 %s846_s11, %s1319_s12 }
 0x2af   :  { %s1321_s13 = spop %1320 }
 0x2b0   :  { %s882_s0 = ssub.f32 %s864_s14, %s1321_s13 }
 0x2b1   :  { %s1323_s15 = spop %1322 }
 0x2b2   :  { %s900_s16 = ssub.f32 %s882_s0, %s1323_s15 }
 0x2b4   :  { %s901_s17 = smul.f32 0.125, %s900_s16 }
 0x2b6   :  { %s957_s4 = smul.f32 0.5, %s901_s17 }
 0x2d2   :  { %v947_v50 = vpop.xlane.xlu0 %946 }
 0x2d3   :  { %v948_v51 = vrot.slane %v947_v50, 4 }
 0x2d5   :  { %v949_v52 = vadd.f32 %v948_v51, %v947_v50 }
 0x2d7   :  { %v950_v53 = vrot.slane %v949_v52, 2 }
 0x2d9   :  { %v951_v54 = vadd.f32 %v950_v53, %v949_v52 }
 0x2db   :  { %v952_v55 = vrot.slane %v951_v54, 1 }
 0x2dd   :  { %v953_v56 = vadd.f32 %v952_v55, %v951_v54 }
 0x2df   :  { %1324 = vpush %v953_v56 }
 0x310   :  { %s1325_s18 = spop %1324 }
 0x311   :  { %s955_s1 = smul.f32 9.0, %s1325_s18 }
 0x313   :  { %s956_s19 = smul.f32 0.0009765625, %s955_s1 }
 0x315   :  { %s958_s21 = smul.f32 0.5, %s956_s19 }
 0x317   :  { %s959_s22 = sadd.f32 %s958_s21, %s957_s4 }
 0x319   :  { %961 = sst [smem:[#allocation12]] %s959_s22 }
 0x31a   :  { %970 = dma.smem_to_hbm %s1486_s23, 16, %s968_s20, [#allocation5]  }
 0x31b   :  { %1477 = dma.done.wait [#allocation5], 16  }
 0x31c   :  { %1478 = vsyncadd [#allocation5], 4294967280 }
 0x31d   :  { %975 = sfence }
 0x31e   :  { %976 = vsyncpa [#allocation3], 1 }
 0x31f   :  { %977 = vsyncpa [#allocation8], 1 }
 0x320   :  { %978 = vsyncpa [#allocation11], 1 }
 0x321   :  { %979 = vsyncpa [#allocation4], 1 }
 0x322   :  { %980 = vsyncpa [#allocation5], 1 }

</bundles_post_ra>
